<compile_context>
chip_gen: v5e
topology: v5e:2x2
jax: 0.10.0
libtpu: 0.0.40
codegen_flags: <defaults>
</compile_context>

<pallas_src>
import jax
import jax.numpy as jnp
from jax.experimental import pallas as pl
from jax.experimental.pallas import tpu as pltpu


_LANE_ROWS = 128  # batch rows packed into the lane dim of one repacked row


def _linear1_kernel(x_ref, p_ref, o_ref):
    # x_ref: (Tr, L) lane-duplicated x tile
    # p_ref: (2, L)  row 0 = interleaved weights, row 1 = interleaved biases
    # o_ref: (Tr, L) lane-dense output tile (interleaved out features)
    o_ref[...] = (x_ref[...] * p_ref[0:1, :] + p_ref[1:2, :]).astype(o_ref.dtype)


def _pallas_linear1(x, weight, bias, *, max_block_rows=2048):
    B, in_f = x.shape
    out_f = weight.shape[0]
    L = _LANE_ROWS * out_f  # lane width of the repacked arrays (256 for out_f=2)

    # Pad batch to a multiple of 128 so the lane-dense reshapes are valid.
    Bp = ((B + _LANE_ROWS - 1) // _LANE_ROWS) * _LANE_ROWS
    xp = jnp.pad(x, ((0, Bp - B), (0, 0))) if Bp != B else x

    # Lane-duplicate x: (Bp,1) -> (Bp,out_f) -> (R, L).  Row-major, so lanes
    # 2j / 2j+1 of repacked row r both hold x[128*r + j]; the matching output
    # reshape back to (B, out_f) is therefore free (no transpose).
    # TODO(synk): an in-kernel lane interleave of two (Tr,128) vectors would
    # save this one extra XLA pass over x, but needs a Mosaic lane shuffle;
    # kept in the wrapper for robust lowering.
    R = Bp // _LANE_ROWS
    x2 = jnp.broadcast_to(xp, (Bp, out_f)).reshape(R, L)

    # Interleaved parameter patterns: [w0,w1,w0,w1,...] and [b0,b1,b0,b1,...].
    wpat = jnp.tile(weight.reshape(out_f), _LANE_ROWS)
    bpat = jnp.tile(bias.reshape(out_f), _LANE_ROWS)
    params = jnp.stack([wpat, bpat]).astype(jnp.float32)  # (2, L) lane-dense slab

    # Block-row choice: as large as possible (amortise per-step overhead) but
    # capped so double-buffered in+out tiles fit every generation's scoped
    # VMEM, and split into >= 2 grid steps so both v7x TensorCores get work.
    if R <= 8:
        tr = R
    else:
        steps = max(2, pl.cdiv(R, max_block_rows))
        tr = min(R, ((pl.cdiv(R, steps) + 7) // 8) * 8)
    grid = (pl.cdiv(R, tr),)

    out = pl.pallas_call(
        _linear1_kernel,
        out_shape=jax.ShapeDtypeStruct((R, L), x.dtype),
        grid=grid,
        in_specs=[
            pl.BlockSpec((tr, L), lambda i: (i, 0)),  # lane-duplicated x tile
            pl.BlockSpec((2, L), lambda i: (0, 0)),   # interleaved w/b patterns
        ],
        out_specs=pl.BlockSpec((tr, L), lambda i: (i, 0)),
        compiler_params=pltpu.CompilerParams(
            dimension_semantics=("parallel",),
            vmem_limit_bytes=32 * 1024 * 1024,
        ),
    )(x2, params)

    # Free row-major reshape back to (Bp, out_f); drop padded rows.
    return out.reshape(Bp, out_f)[:B]


def linear(x, weight, bias, *, min_pallas_batch=1024, max_block_rows=2048):
    """nn.Linear(1, out_f): x (B, 1) -> x @ weight.T + bias, weight (out_f, 1)."""
    B, in_f = x.shape
    out_f, w_in = weight.shape
    assert in_f == 1 and w_in == 1, "this kernel specializes nn.Linear(1, out)"

    if B < min_pallas_batch:
        # Tiny batch: fixed kernel-launch / single-grid-step cost exceeds the
        # whole op; XLA fuses this elementwise expression for free.
        return (x * weight.T + bias.reshape(1, out_f)).astype(x.dtype)

    return _pallas_linear1(x, weight, bias, max_block_rows=max_block_rows)


if __name__ == "__main__":
    key = jax.random.PRNGKey(0)
    kx, kw, kb, kx2 = jax.random.split(key, 4)

    # Deterministic parameters for nn.Linear(1, 2): weight (2, 1), bias (2,)
    weight = jax.random.normal(kw, (2, 1), dtype=jnp.float32)
    bias = jax.random.normal(kb, (2,), dtype=jnp.float32)

    # Path 1: tiny batch consistent with the module -> fused fast path.
    x_small = jax.random.normal(kx, (8, 1), dtype=jnp.float32)
    out_small = jax.block_until_ready(linear(x_small, weight, bias))
    ref_small = x_small @ weight.T + bias
    assert out_small.shape == (8, 2)
    assert jnp.allclose(out_small, ref_small, atol=1e-5, rtol=1e-5)

    # Path 2: Pallas kernel path (lane-dense repack; B not a multiple of 128
    # exercises the padding + slice-back handling, grid has 2 steps).
    B = 2000
    x_big = jax.random.normal(kx2, (B, 1), dtype=jnp.float32)
    out_big = jax.block_until_ready(linear(x_big, weight, bias))
    ref_big = x_big @ weight.T + bias
    assert out_big.shape == (B, 2)
    assert jnp.allclose(out_big, ref_big, atol=1e-5, rtol=1e-5)

    print("KERNEL_OK")
</pallas_src>

<mosaic_0001>
module attributes {stable_mosaic.version = 11 : i64} {
  func.func @_linear1_kernel(%arg0: i32, %arg1: memref<8x256xf32, #tpu.memory_space<vmem>>, %arg2: memref<2x256xf32, #tpu.memory_space<vmem>>, %arg3: memref<8x256xf32, #tpu.memory_space<vmem>>) attributes {dimension_semantics = [#tpu.dimension_semantics<parallel>], iteration_bounds = array<i64: 2>, scalar_prefetch = 0 : i64, scratch_operands = 0 : i64, tpu.core_type = #tpu.core_type<tc>, window_params = [{transform_indices = @transform_0, window_bounds = array<i64: 8, 256>}, {pipeline_mode = #tpu.pipeline_mode<synchronous>, transform_indices = @transform_1, window_bounds = array<i64: 2, 256>}, {transform_indices = @transform_2, window_bounds = array<i64: 8, 256>}]} {
    %c0 = arith.constant 0 : index
    %c0_0 = arith.constant 0 : index
    %0 = vector.load %arg1[%c0, %c0_0] : memref<8x256xf32, #tpu.memory_space<vmem>>, vector<8x256xf32>
    %c0_1 = arith.constant 0 : index
    %c0_2 = arith.constant 0 : index
    %1 = vector.load %arg2[%c0_1, %c0_2] : memref<2x256xf32, #tpu.memory_space<vmem>>, vector<1x256xf32>
    %2 = vector.broadcast %1 : vector<1x256xf32> to vector<8x256xf32>
    %3 = arith.mulf %0, %2 : vector<8x256xf32>
    %c1 = arith.constant 1 : index
    %c0_3 = arith.constant 0 : index
    %4 = vector.load %arg2[%c1, %c0_3] : memref<2x256xf32, #tpu.memory_space<vmem>>, vector<1x256xf32>
    %5 = vector.broadcast %4 : vector<1x256xf32> to vector<8x256xf32>
    %6 = arith.addf %3, %5 : vector<8x256xf32>
    %c0_4 = arith.constant 0 : index
    %c0_5 = arith.constant 0 : index
    %7 = vector.load %arg3[%c0_4, %c0_5] : memref<8x256xf32, #tpu.memory_space<vmem>>, vector<8x256xf32>
    tpu.vector_store %arg3[%c0_4, %c0_5], %6 {strides = array<i32>} : memref<8x256xf32, #tpu.memory_space<vmem>>, vector<8x256xf32>,
    return
  }
  func.func @transform_0(%arg0: i32) -> (i32, i32) {
    %c0_i32 = arith.constant 0 : i32
    %c0_i32_0 = arith.constant 0 : i32
    return %arg0, %c0_i32 : i32, i32
  }
  func.func @transform_1(%arg0: i32) -> (i32, i32) {
    %c0_i32 = arith.constant 0 : i32
    %c0_i32_0 = arith.constant 0 : i32
    %c0_i32_1 = arith.constant 0 : i32
    return %c0_i32, %c0_i32_0 : i32, i32
  }
  func.func @transform_2(%arg0: i32) -> (i32, i32) {
    %c0_i32 = arith.constant 0 : i32
    %c0_i32_0 = arith.constant 0 : i32
    return %arg0, %c0_i32 : i32, i32
  }
}

</mosaic_0001>

<bundles_post_ra>
// kernel: tpu_custom_call.1
= control target key start
LH: loop header
LB: loop body
LE: loop exit
PB: predicated region body
PF: predicated region fallthrough
CT: control target
= control target key end

     0   :  { %7 = vsyncpa [#allocation3], 0  ;;  %s656_s0 = inlined_call_operand.hbm [shape: f32[16,256], index: 0, kind: input, shape index: {}]   ;;  %s657_s1 = inlined_call_operand.hbm [shape: f32[2,256], index: 1, kind: input, shape index: {}]   ;;  %s658_s2 = inlined_call_operand.hbm [shape: f32[16,256], index: 2, kind: output, shape index: {}]  }
   0x1   :  { %9 = vsyncpa [#allocation3 + $0x1], 0 }
   0x2   :  { %10 = vsyncpa [#allocation6], 0 }
   0x3   :  { %11 = vsyncpa [#allocation4], 0 }
   0x4   :  { %13 = vsyncpa [#allocation4 + $0x1], 0  ;;  %s518_s9 = smov 0   ;;  %s520_s10 = smov 0  }
   0x5   :  { %s522_s11 = smov 0   ;;  %s524_s12 = smov 0  }
   0x6 LB: > { %s539_s13 = sadd.s32 4294967295, %s500_s12   ;;  %s295_s14 = sadd.s32 4294967294, %s500_s12   ;;  %s500_s12 = sphi %s524_s12, %s668_s12   ;;  %s496_s11 = sphi %s522_s11, %s667_s11   ;;  %s492_s10 = sphi %s520_s10, %s666_s10   ;;  %s488_s9 = sphi %s518_s9, %s665_s9  }
   0x7   : > { %p39_p0 = scmp.ne.s32.totalorder %s492_s10, %s488_s9  ;;  %p40_p1 = scmp.eq.s32.totalorder %s539_s13, 0 }
   0x8   : > { %p84_p2 = scmp.eq.s32.totalorder %s539_s13, 1  ;;  %p90_p3 = scmp.eq.s32.totalorder %s295_s14, 1 }
   0x9   : > { %p548_p4 = por %p40_p1, %p39_p0  ;;  %p296_p5 = scmp.ge.s32.totalorder %s500_s12, 1 }
   0xa   : > { %p553_p6 = por %p90_p3, %p39_p0  ;;  %p97_p7 = scmp.lt.s32.totalorder %s500_s12, 3 }
   0xb   : > { %s109_s19 = sshll.u32 %s657_s1, 4  ;;  %s502_s21 = smov [#allocation5]   ;;  %s110_s19 = int_to_ptr.hbm [resolvable:$true] %s109_s19 }
   0xc   : > { %p561_p8 = pnand %p296_p5, %p97_p7  ;;  %s111_s22 = sshll.u32 %s502_s21, 4  ;;  %s112_s22 = int_to_ptr.vmem [resolvable:$true] %s111_s22 }
   0xd   : > { %s571_s23 = sadd.s32 1, %s500_s12   ;;  %s26_s24 = sadd.s32 1, %s496_s11 }
   0xe   : > { %p321_p10 = pneg %p561_p8  ;;  %s23_s25 = ssub.s32 %s500_s12, %s571_s23 }
   0xf   : > { %p24_p12 = scmp.eq.s32.totalorder %s23_s25, 0  ;;  %p33_p13 = scmp.ne.s32.totalorder %s496_s11, %s492_s10 }
  0x10   : > { %p322_p11 = pnand %p321_p10, %p40_p1  ;;  %p34_p0 = scmp.eq.s32.totalorder %s500_s12, 0 }
  0x11   : > { %s580_s26 = scalar_select %p24_p12, %s496_s11, %s26_s24  }
  0x12   : > { %324 = dma.hbm_to_vmem [thread:$0]  (!%p322_p11), %s110_s19, 64, %s112_s22, [#allocation6]  }
  0x13   : > { %p584_p3 = por %p84_p2, %p33_p13  ;;  %p334_p5 = scmp.lt.s32.totalorder %s500_s12, 2 }
  0x14   : > { %s122_s28 = sand.u32 1, %s496_s11   ;;  %s311_s29 = sshll.u32 %s500_s12, 4 }
  0x15   : > { %p35_p7 = por %p34_p0, %p33_p13  ;;  %s299_s30 = sshll.u32 %s122_s28, 4 }
  0x16   : > { %s131_s5 = scalar_lea.hbm %s656_s0, %s311_s29  ;;  %s126_s7 = scalar_lea.vmem [#allocation2], %s299_s30 }
  0x17   : > { %s133_s6 = sshll.u32 %s131_s5, 4  ;;  %s135_s8 = sshll.u32 %s126_s7, 4  ;;  %s134_s6 = int_to_ptr.hbm [resolvable:$true] %s133_s6  ;;  %s136_s8 = int_to_ptr.vmem [resolvable:$true] %s135_s8 }
  0x18   : > { %p594_p10 = pnand %p334_p5, %p35_p7  ;;  %s123_s17 = scalar_lea.sflag [#allocation3], %s122_s28 }
  0x19   : > { %s400_s18 = sshra.s32 %s134_s6, 4  ;;  %s407_s24 = scalar_lea.hbm %s656_s0, 32  ;;  %s401_s18 = int_to_ptr.hbm [resolvable:$true] %s400_s18 }
  0x1a   : > { %s402_s19 = scalar_lea.hbm %s401_s18, 16  ;;  %p404_p11 = pneg %p594_p10 }
  0x1b   : > { %p403_p2 = scmp.ne.s32.totalorder %s401_s18, %s402_s19  ;;  %p408_p0 = scmp.lt.s32.totalorder %s401_s18, %s656_s0 }
  0x1c   : > { %p409_p5 = scmp.lt.s32.totalorder %s407_s24, %s402_s19 }
  0x1d   : > { %p405_p12 = pnand %p404_p11, %p403_p2 }
  0x1e   : > { %p410_p7 = por %p409_p5, %p408_p0 }
  0x1f   : > { %p406_p13 = pneg %p405_p12 }
  0x21   : > { %p411_p9 = pnand %p410_p7, %p406_p13 }
  0x23   : > { %414 = shalt.err (!%p411_p9)
}
  0x24   : > { %328 = dma.hbm_to_vmem [thread:$0]  (!%p594_p10), %s134_s6, 256, %s136_s8, %s123_s17  }
  0x25   : > { %144 = sbr.rel (%p561_p8) target bundleno = 60 (0x3c), region = 28  ;;  %s611_s28 = sand.u32 (!%p561_p8), 1, %s492_s10  }
  0x26   : > { %s303_s30 = sshll.u32 (!%p561_p8), %s611_s28, 4  ;;  %s147_s3 = scalar_lea.sflag (!%p561_p8), [#allocation3], %s611_s28 }
  0x27   : > { %s150_s4 = scalar_lea.vmem (!%p561_p8), [#allocation2], %s303_s30 }
  0x2a   : > { %475 = dma.done.wait (%p548_p4), %s147_s3, 256  }
  0x2b   : > { %477 = vsyncadd (%p548_p4), %s147_s3, 4294967040 }
  0x2c   : > { %479 = dma.done.wait (%p40_p1), [#allocation6], 64  }
  0x2d   : > { %481 = vsyncadd (%p40_p1), [#allocation6], 4294967232  ;;  %s312_s20 = sshll.u32 %s539_s13, 4  ;;  %v177_v0 = vld [vmem:[%s150_s4] sm:$0xff]  ;;  %v178_v2 = vld [vmem:[%s150_s4 + $0x8] sm:$0xff]  ;;  %s176_s15 = scalar_lea.vmem [#allocation7], %s303_s30 }
  0x2e   : > { %v179_v1 = vld [vmem:[#allocation5] ss:$2 sm:$0x3]  ;;  %s210_s7 = scalar_lea.hbm %s658_s2, %s312_s20  ;;  %v188_v4 = vld [vmem:[#allocation5 + $0x1] ss:$2 sm:$0x3] }
  0x2f   : > { %v181_v3 = vperm.slane %v179_v1, 0  ;;  %v182_v5 = vperm.slane %v179_v1, 1  ;;  %v190_v6 = vperm.slane %v188_v4, 0  ;;  %v191_v7 = vperm.slane %v188_v4, 1  ;;  %s212_s8 = sshll.u32 %s176_s15, 4  ;;  %s214_s14 = sshll.u32 %s210_s7, 4  ;;  %s213_s8 = int_to_ptr.vmem [resolvable:$true] %s212_s8  ;;  %s215_s14 = int_to_ptr.hbm [resolvable:$true] %s214_s14 }
  0x30   : > { %s199_s13 = scalar_lea.sflag [#allocation4], %s611_s28  ;;  %s444_s17 = sshra.s32 %s215_s14, 4  ;;  %s445_s17 = int_to_ptr.hbm [resolvable:$true] %s444_s17 }
  0x31   : > { %v185_v8 = vmul.f32 %v181_v3, %v177_v0  ;;  %v186_v9 = vmul.f32 %v182_v5, %v178_v2  ;;  %s446_s18 = scalar_lea.hbm %s445_s17, 16  ;;  %s450_s22 = scalar_lea.hbm %s658_s2, 32 }
  0x32   : > { %p447_p1 = scmp.ne.s32.totalorder %s445_s17, %s446_s18  ;;  %p451_p9 = scmp.lt.s32.totalorder %s445_s17, %s658_s2 }
  0x33   : > { %v194_v10 = vadd.f32 %v190_v6, %v185_v8  ;;  %v195_v11 = vadd.f32 %v191_v7, %v186_v9  ;;  %p452_p10 = scmp.lt.s32.totalorder %s450_s22, %s446_s18 }
  0x34   : > { %p448_p4 = pnand %p447_p1, %p584_p3 }
  0x35   : > { %196 = vst [vmem:[%s176_s15] sm:$0xff] %v194_v10  ;;  %p453_p2 = por %p452_p10, %p451_p9 }
  0x36   : > { %197 = vst [vmem:[%s176_s15 + $0x8] sm:$0xff] %v195_v11  ;;  %p449_p8 = pneg %p448_p4 }
  0x38   : > { %p454_p11 = pnand %p453_p2, %p449_p8 }
  0x3a   : > { %457 = shalt.err (!%p454_p11)
}
  0x3b   : > { %319 = dma.vmem_to_hbm [thread:$0]  (%p584_p3), %s213_s8, 256, %s215_s14, %s199_s13  }
  0x3c PF: > { %s226_s29 = sand.u32 1, %s488_s9   ;;  %p664_p12 = scmp.ge.s32.totalorder %s500_s12, 2 }
  0x3d   : > { %s227_s28 = scalar_lea.sflag [#allocation4], %s226_s29 }
  0x3e   : > { %p330_p13 = pnand %p664_p12, %p553_p6 }
  0x40   : > { %p331_p0 = pneg %p330_p13 }
  0x42   : > { %483 = dma.done.wait (%p331_p0), %s227_s28, 256  }
  0x43   : > { %485 = vsyncadd (%p331_p0), %s227_s28, 4294967040  ;;  %p16_p5 = scmp.ge.s32.totalorder %s571_s23, 4   ;;  %s665_s9 = smov %s492_s10 }
  0x44   : > { %s666_s10 = smov %s496_s11  ;;  %s667_s11 = smov %s580_s26 }
  0x45   : > { %s668_s12 = smov %s571_s23  ;;  %18 = sbr.rel (!%p16_p5) target bundleno = 6 (0x6), region = 78 }
  0x4a   :  { %233 = vsyncpa [#allocation3], 1 }
  0x4b   :  { %235 = vsyncpa [#allocation3 + $0x1], 1 }
  0x4c   :  { %236 = vsyncpa [#allocation6], 1 }
  0x4d   :  { %237 = vsyncpa [#allocation4], 1 }
  0x4e   :  { %239 = vsyncpa [#allocation4 + $0x1], 1 }

</bundles_post_ra>
